<compile_context>
chip_gen: v5e
topology: v5e:2x2
jax: 0.10.0
libtpu: 0.0.40
codegen_flags: <defaults>
</compile_context>

<pallas_src>
import jax
import jax.numpy as jnp
from jax.experimental import pallas as pl
from jax.experimental.pallas import tpu as pltpu

LANE = 128     # lane width (last-dim tiling unit)
SUBLANE = 8    # sublane width (second-to-last-dim tiling unit)


def _cdiv(a, b):
    return (a + b - 1) // b


def _round_up(x, m):
    return _cdiv(x, m) * m


def bert_output_kernel(x_ref, w1_ref, b1_ref, w2_ref, b2_ref, o_ref):
    # x arrives in its storage dtype (f32); cast in-register to the MXU
    # compute dtype (bf16) right before the matmul — no wrapper-side cast pass.
    x = x_ref[...].astype(w1_ref.dtype)
    # dense: x @ W1 (bf16 operands, f32 accumulation on the MXU)
    h = jnp.dot(x, w1_ref[...], preferred_element_type=jnp.float32)
    # bias + relu in f32
    h = jnp.maximum(h + b1_ref[...], 0.0)
    # dropout: eval-mode identity (PyTorch nn.Dropout is a no-op in eval).
    # TODO(synk): training-mode dropout would use pltpu.prng_seed/prng_random_bits.
    # out_proj: h @ W2 + b2 (lane-padded N, bf16 operands, f32 accumulation)
    out = jnp.dot(h.astype(w2_ref.dtype), w2_ref[...],
                  preferred_element_type=jnp.float32)
    out = out + b2_ref[...]
    o_ref[...] = out.astype(o_ref.dtype)


def prepare_bert_output_params(w1, b1, w2, b2, *, compute_dtype=jnp.bfloat16):
    """One-time parameter prep (cast to MXU dtype + lane-pad the label axis).

    Call once at parameter-load time; the per-step forward pass then does no
    weight re-cast / re-pad HBM traffic.
      w1: (H, H)   b1: (H,)   w2: (H, L)   b2: (L,)
    """
    hidden, num_labels = w2.shape
    labels_p = _round_up(num_labels, LANE)
    return {
        "w1": w1.astype(compute_dtype),
        "b1": b1.reshape(1, hidden).astype(jnp.float32),
        "w2": jnp.pad(w2, ((0, 0), (0, labels_p - num_labels))).astype(compute_dtype),
        "b2": jnp.pad(b2, (0, labels_p - num_labels)).reshape(1, labels_p)
                 .astype(jnp.float32),
        "num_labels": num_labels,
    }


def bert_output_layer(x, params, *, block_tokens=1024, out_dtype=None):
    """x: (tokens, H) in f32/bf16; params from prepare_bert_output_params."""
    tokens, hidden = x.shape
    w1, b1, w2, b2 = params["w1"], params["b1"], params["w2"], params["b2"]
    num_labels = params["num_labels"]
    labels_p = w2.shape[1]
    out_dtype = x.dtype if out_dtype is None else out_dtype

    # ---- token tiling ---------------------------------------------------
    # Compute the grid first, then the tile, to bound tail padding to the
    # alignment unit rather than (block_tokens - 1) rows.
    block_tokens = max(SUBLANE, _round_up(block_tokens, SUBLANE))
    grid_n = _cdiv(tokens, block_tokens)
    # v7x megacore: keep >= 2 token tiles whenever there is enough work so the
    # "parallel" grid axis can actually shard across both TensorCores.
    if grid_n < 2 and tokens > SUBLANE:
        grid_n = 2
    tm = _cdiv(tokens, grid_n)
    align = LANE if tm >= LANE else SUBLANE          # full-height MXU passes when big
    tm = _round_up(tm, align)
    grid_n = _cdiv(tokens, tm)                       # drop fully-empty tail tiles
    tokens_p = grid_n * tm

    # Zero-pad only the ragged tail rows (no dtype cast of x in the wrapper).
    x_p = x if tokens_p == tokens else jnp.pad(x, ((0, tokens_p - tokens), (0, 0)))

    # ---- VMEM budget (generation-aware) ----------------------------------
    xbytes = jnp.dtype(x.dtype).itemsize
    cbytes = jnp.dtype(w1.dtype).itemsize
    obytes = jnp.dtype(out_dtype).itemsize
    vmem_bytes = (
        2 * tm * hidden * xbytes            # double-buffered x tile
        + 2 * hidden * hidden * cbytes      # W1 (conservative: 2 bufs)
        + 2 * hidden * labels_p * cbytes    # W2 (conservative: 2 bufs)
        + 2 * (hidden + labels_p) * 4       # biases (f32)
        + 2 * tm * labels_p * obytes        # double-buffered output tile
        + tm * (hidden + labels_p) * 4      # f32 intermediates (h, out)
    )
    try:
        info = pltpu.get_tpu_info()
        vmem_cap = int(getattr(info, "vmem_capacity_bytes", 64 << 20))
    except Exception:
        vmem_cap = 64 << 20                 # conservative if query unavailable
    vmem_limit = int(min(max(int(1.5 * vmem_bytes), 8 << 20), int(0.75 * vmem_cap)))

    # ---- pallas_call ------------------------------------------------------
    def _call(resident_mode):
        resident_kw = {} if resident_mode is None else {"pipeline_mode": resident_mode}
        grid_spec = pltpu.PrefetchScalarGridSpec(
            num_scalar_prefetch=0,
            grid=(grid_n,),
            in_specs=[
                pl.BlockSpec((tm, hidden), lambda i: (i, 0)),                       # x tile (streamed)
                pl.BlockSpec((hidden, hidden), lambda i: (0, 0), **resident_kw),    # W1 resident
                pl.BlockSpec((1, hidden), lambda i: (0, 0), **resident_kw),         # b1 resident
                pl.BlockSpec((hidden, labels_p), lambda i: (0, 0), **resident_kw),  # W2 resident
                pl.BlockSpec((1, labels_p), lambda i: (0, 0), **resident_kw),       # b2 resident
            ],
            out_specs=pl.BlockSpec((tm, labels_p), lambda i: (i, 0)),
        )
        return pl.pallas_call(
            bert_output_kernel,
            out_shape=jax.ShapeDtypeStruct((tokens_p, labels_p), out_dtype),
            grid_spec=grid_spec,
            compiler_params=pltpu.CompilerParams(
                dimension_semantics=("parallel",),
                vmem_limit_bytes=vmem_limit,
            ),
        )(x_p, w1, b1, w2, b2)

    try:
        # Resident weights/biases have a constant index_map -> single-buffer
        # them (double buffering them is pure VMEM waste).
        out_p = _call(pl.Buffered(1))
    except Exception:
        # Fallback for environments where Buffered(1) isn't accepted on inputs.
        out_p = _call(None)

    # Strip token / label padding.
    return out_p[:tokens, :num_labels]


if __name__ == "__main__":
    # Small config consistent with the module: hidden_size=32, num_labels=4,
    # batch=2, seq=8  ->  x is (batch, seq, hidden).
    batch, seq, hidden, num_labels = 2, 8, 32, 4

    key = jax.random.PRNGKey(0)
    kx, kw1, kb1, kw2, kb2 = jax.random.split(key, 5)

    x = jax.random.normal(kx, (batch, seq, hidden), dtype=jnp.float32)
    # nn.Linear(hidden, hidden): weight (out,in) -> stored transposed (in,out)
    w1 = jax.random.normal(kw1, (hidden, hidden), dtype=jnp.float32) * 0.02
    b1 = jax.random.normal(kb1, (hidden,), dtype=jnp.float32) * 0.02
    # nn.Linear(hidden, num_labels)
    w2 = jax.random.normal(kw2, (hidden, num_labels), dtype=jnp.float32) * 0.02
    b2 = jax.random.normal(kb2, (num_labels,), dtype=jnp.float32) * 0.02

    # One-time parameter prep (cast + lane-pad), then forward on flat tokens.
    params = prepare_bert_output_params(w1, b1, w2, b2)
    x_flat = x.reshape(batch * seq, hidden)
    out_flat = bert_output_layer(x_flat, params)
    out = out_flat.reshape(batch, seq, num_labels)
    jax.block_until_ready(out)

    # Reference check in plain JAX (same semantics as the PyTorch forward,
    # eval mode). Tolerance loosened for bf16 operands with f32 accumulation.
    ref = jnp.maximum(x_flat @ w1 + b1, 0.0) @ w2 + b2
    assert out_flat.shape == ref.shape
    assert jnp.allclose(out_flat, ref, atol=1e-2, rtol=1e-2), float(
        jnp.max(jnp.abs(out_flat - ref)))

    print("KERNEL_OK")
</pallas_src>

<mosaic_0001>
module attributes {stable_mosaic.version = 11 : i64} {
  func.func @bert_output_kernel(%arg0: i32, %arg1: memref<8x32xf32, #tpu.memory_space<vmem>>, %arg2: memref<32x32xbf16, #tpu.memory_space<vmem>>, %arg3: memref<1x32xf32, #tpu.memory_space<vmem>>, %arg4: memref<32x128xbf16, #tpu.memory_space<vmem>>, %arg5: memref<1x128xf32, #tpu.memory_space<vmem>>, %arg6: memref<8x128xf32, #tpu.memory_space<vmem>>) attributes {dimension_semantics = [#tpu.dimension_semantics<parallel>], iteration_bounds = array<i64: 2>, scalar_prefetch = 0 : i64, scratch_operands = 0 : i64, tpu.core_type = #tpu.core_type<tc>, window_params = [{transform_indices = @transform_0, window_bounds = array<i64: 8, 32>}, {pipeline_mode = #tpu.pipeline_mode<synchronous>, transform_indices = @transform_1, window_bounds = array<i64: 32, 32>}, {pipeline_mode = #tpu.pipeline_mode<synchronous>, transform_indices = @transform_2, window_bounds = array<i64: 1, 32>}, {pipeline_mode = #tpu.pipeline_mode<synchronous>, transform_indices = @transform_3, window_bounds = array<i64: 32, 128>}, {pipeline_mode = #tpu.pipeline_mode<synchronous>, transform_indices = @transform_4, window_bounds = array<i64: 1, 128>}, {transform_indices = @transform_5, window_bounds = array<i64: 8, 128>}]} {
    %c0 = arith.constant 0 : index
    %c0_0 = arith.constant 0 : index
    %0 = vector.load %arg1[%c0, %c0_0] : memref<8x32xf32, #tpu.memory_space<vmem>>, vector<8x32xf32>
    %1 = arith.truncf %0 : vector<8x32xf32> to vector<8x32xbf16>
    %c0_1 = arith.constant 0 : index
    %c0_2 = arith.constant 0 : index
    %2 = vector.load %arg2[%c0_1, %c0_2] : memref<32x32xbf16, #tpu.memory_space<vmem>>, vector<32x32xbf16>
    %cst = arith.constant dense<0.000000e+00> : vector<8x32xf32>
    %3 = tpu.matmul %1, %2, %cst {dimension_numbers = #tpu.dot_dimension_numbers<[1], [0], [0], [1], [0, 0, 1, 1], [], []>} : vector<8x32xbf16>, vector<32x32xbf16>, vector<8x32xf32> -> vector<8x32xf32>
    %c0_3 = arith.constant 0 : index
    %c0_4 = arith.constant 0 : index
    %4 = vector.load %arg3[%c0_3, %c0_4] : memref<1x32xf32, #tpu.memory_space<vmem>>, vector<1x32xf32>
    %5 = vector.broadcast %4 : vector<1x32xf32> to vector<8x32xf32>
    %6 = arith.addf %3, %5 : vector<8x32xf32>
    %cst_5 = arith.constant 0.000000e+00 : f32
    %7 = vector.broadcast %cst_5 : f32 to vector<8x32xf32>
    %8 = arith.maximumf %6, %7 : vector<8x32xf32>
    %9 = arith.truncf %8 : vector<8x32xf32> to vector<8x32xbf16>
    %c0_6 = arith.constant 0 : index
    %c0_7 = arith.constant 0 : index
    %10 = vector.load %arg4[%c0_6, %c0_7] : memref<32x128xbf16, #tpu.memory_space<vmem>>, vector<32x128xbf16>
    %cst_8 = arith.constant dense<0.000000e+00> : vector<8x128xf32>
    %11 = tpu.matmul %9, %10, %cst_8 {dimension_numbers = #tpu.dot_dimension_numbers<[1], [0], [0], [1], [0, 0, 1, 1], [], []>} : vector<8x32xbf16>, vector<32x128xbf16>, vector<8x128xf32> -> vector<8x128xf32>
    %c0_9 = arith.constant 0 : index
    %c0_10 = arith.constant 0 : index
    %12 = vector.load %arg5[%c0_9, %c0_10] : memref<1x128xf32, #tpu.memory_space<vmem>>, vector<1x128xf32>
    %13 = vector.broadcast %12 : vector<1x128xf32> to vector<8x128xf32>
    %14 = arith.addf %11, %13 : vector<8x128xf32>
    %c0_11 = arith.constant 0 : index
    %c0_12 = arith.constant 0 : index
    %15 = vector.load %arg6[%c0_11, %c0_12] : memref<8x128xf32, #tpu.memory_space<vmem>>, vector<8x128xf32>
    tpu.vector_store %arg6[%c0_11, %c0_12], %14 {strides = array<i32>} : memref<8x128xf32, #tpu.memory_space<vmem>>, vector<8x128xf32>,
    return
  }
  func.func @transform_0(%arg0: i32) -> (i32, i32) {
    %c0_i32 = arith.constant 0 : i32
    %c0_i32_0 = arith.constant 0 : i32
    return %arg0, %c0_i32 : i32, i32
  }
  func.func @transform_1(%arg0: i32) -> (i32, i32) {
    %c0_i32 = arith.constant 0 : i32
    %c0_i32_0 = arith.constant 0 : i32
    %c0_i32_1 = arith.constant 0 : i32
    return %c0_i32, %c0_i32_0 : i32, i32
  }
  func.func @transform_2(%arg0: i32) -> (i32, i32) {
    %c0_i32 = arith.constant 0 : i32
    %c0_i32_0 = arith.constant 0 : i32
    %c0_i32_1 = arith.constant 0 : i32
    return %c0_i32, %c0_i32_0 : i32, i32
  }
  func.func @transform_3(%arg0: i32) -> (i32, i32) {
    %c0_i32 = arith.constant 0 : i32
    %c0_i32_0 = arith.constant 0 : i32
    %c0_i32_1 = arith.constant 0 : i32
    return %c0_i32, %c0_i32_0 : i32, i32
  }
  func.func @transform_4(%arg0: i32) -> (i32, i32) {
    %c0_i32 = arith.constant 0 : i32
    %c0_i32_0 = arith.constant 0 : i32
    %c0_i32_1 = arith.constant 0 : i32
    return %c0_i32, %c0_i32_0 : i32, i32
  }
  func.func @transform_5(%arg0: i32) -> (i32, i32) {
    %c0_i32 = arith.constant 0 : i32
    %c0_i32_0 = arith.constant 0 : i32
    return %arg0, %c0_i32 : i32, i32
  }
}

module attributes {stable_mosaic.version = 11 : i64} {
  func.func @bert_output_kernel(%arg0: i32, %arg1: memref<8x32xf32, #tpu.memory_space<vmem>>, %arg2: memref<32x32xbf16, #tpu.memory_space<vmem>>, %arg3: memref<1x32xf32, #tpu.memory_space<vmem>>, %arg4: memref<32x128xbf16, #tpu.memory_space<vmem>>, %arg5: memref<1x128xf32, #tpu.memory_space<vmem>>, %arg6: memref<8x128xf32, #tpu.memory_space<vmem>>) attributes {dimension_semantics = [#tpu.dimension_semantics<parallel>], iteration_bounds = array<i64: 2>, scalar_prefetch = 0 : i64, scratch_operands = 0 : i64, tpu.core_type = #tpu.core_type<tc>, window_params = [{transform_indices = @transform_0, window_bounds = array<i64: 8, 32>}, {pipeline_mode = #tpu.pipeline_mode<synchronous>, transform_indices = @transform_1, window_bounds = array<i64: 32, 32>}, {pipeline_mode = #tpu.pipeline_mode<synchronous>, transform_indices = @transform_2, window_bounds = array<i64: 1, 32>}, {pipeline_mode = #tpu.pipeline_mode<synchronous>, transform_indices = @transform_3, window_bounds = array<i64: 32, 128>}, {pipeline_mode = #tpu.pipeline_mode<synchronous>, transform_indices = @transform_4, window_bounds = array<i64: 1, 128>}, {transform_indices = @transform_5, window_bounds = array<i64: 8, 128>}]} {
    %c0 = arith.constant 0 : index
    %c0_0 = arith.constant 0 : index
    %0 = vector.load %arg1[%c0, %c0_0] : memref<8x32xf32, #tpu.memory_space<vmem>>, vector<8x32xf32>
    %1 = arith.truncf %0 : vector<8x32xf32> to vector<8x32xbf16>
    %c0_1 = arith.constant 0 : index
    %c0_2 = arith.constant 0 : index
    %2 = vector.load %arg2[%c0_1, %c0_2] : memref<32x32xbf16, #tpu.memory_space<vmem>>, vector<32x32xbf16>
    %cst = arith.constant dense<0.000000e+00> : vector<8x32xf32>
    %3 = tpu.matmul %1, %2, %cst {dimension_numbers = #tpu.dot_dimension_numbers<[1], [0], [0], [1], [0, 0, 1, 1], [], []>} : vector<8x32xbf16>, vector<32x32xbf16>, vector<8x32xf32> -> vector<8x32xf32>
    %c0_3 = arith.constant 0 : index
    %c0_4 = arith.constant 0 : index
    %4 = vector.load %arg3[%c0_3, %c0_4] : memref<1x32xf32, #tpu.memory_space<vmem>>, vector<1x32xf32>
    %5 = vector.broadcast %4 : vector<1x32xf32> to vector<8x32xf32>
    %6 = arith.addf %3, %5 : vector<8x32xf32>
    %cst_5 = arith.constant 0.000000e+00 : f32
    %7 = vector.broadcast %cst_5 : f32 to vector<8x32xf32>
    %8 = arith.maximumf %6, %7 : vector<8x32xf32>
    %9 = arith.truncf %8 : vector<8x32xf32> to vector<8x32xbf16>
    %c0_6 = arith.constant 0 : index
    %c0_7 = arith.constant 0 : index
    %10 = vector.load %arg4[%c0_6, %c0_7] : memref<32x128xbf16, #tpu.memory_space<vmem>>, vector<32x128xbf16>
    %cst_8 = arith.constant dense<0.000000e+00> : vector<8x128xf32>
    %11 = tpu.matmul %9, %10, %cst_8 {dimension_numbers = #tpu.dot_dimension_numbers<[1], [0], [0], [1], [0, 0, 1, 1], [], []>} : vector<8x32xbf16>, vector<32x128xbf16>, vector<8x128xf32> -> vector<8x128xf32>
    %c0_9 = arith.constant 0 : index
    %c0_10 = arith.constant 0 : index
    %12 = vector.load %arg5[%c0_9, %c0_10] : memref<1x128xf32, #tpu.memory_space<vmem>>, vector<1x128xf32>
    %13 = vector.broadcast %12 : vector<1x128xf32> to vector<8x128xf32>
    %14 = arith.addf %11, %13 : vector<8x128xf32>
    %c0_11 = arith.constant 0 : index
    %c0_12 = arith.constant 0 : index
    %15 = vector.load %arg6[%c0_11, %c0_12] : memref<8x128xf32, #tpu.memory_space<vmem>>, vector<8x128xf32>
    tpu.vector_store %arg6[%c0_11, %c0_12], %14 {strides = array<i32>} : memref<8x128xf32, #tpu.memory_space<vmem>>, vector<8x128xf32>,
    return
  }
  func.func @transform_0(%arg0: i32) -> (i32, i32) {
    %c0_i32 = arith.constant 0 : i32
    %c0_i32_0 = arith.constant 0 : i32
    return %arg0, %c0_i32 : i32, i32
  }
  func.func @transform_1(%arg0: i32) -> (i32, i32) {
    %c0_i32 = arith.constant 0 : i32
    %c0_i32_0 = arith.constant 0 : i32
    %c0_i32_1 = arith.constant 0 : i32
    return %c0_i32, %c0_i32_0 : i32, i32
  }
  func.func @transform_2(%arg0: i32) -> (i32, i32) {
    %c0_i32 = arith.constant 0 : i32
    %c0_i32_0 = arith.constant 0 : i32
    %c0_i32_1 = arith.constant 0 : i32
    return %c0_i32, %c0_i32_0 : i32, i32
  }
  func.func @transform_3(%arg0: i32) -> (i32, i32) {
    %c0_i32 = arith.constant 0 : i32
    %c0_i32_0 = arith.constant 0 : i32
    %c0_i32_1 = arith.constant 0 : i32
    return %c0_i32, %c0_i32_0 : i32, i32
  }
  func.func @transform_4(%arg0: i32) -> (i32, i32) {
    %c0_i32 = arith.constant 0 : i32
    %c0_i32_0 = arith.constant 0 : i32
    %c0_i32_1 = arith.constant 0 : i32
    return %c0_i32, %c0_i32_0 : i32, i32
  }
  func.func @transform_5(%arg0: i32) -> (i32, i32) {
    %c0_i32 = arith.constant 0 : i32
    %c0_i32_0 = arith.constant 0 : i32
    return %arg0, %c0_i32 : i32, i32
  }
}

</mosaic_0001>

<bundles_post_ra>
// kernel: tpu_custom_call.1
= control target key start
LH: loop header
LB: loop body
LE: loop exit
PB: predicated region body
PF: predicated region fallthrough
CT: control target
= control target key end

     0   :  { %10 = vsyncpa [#allocation3], 0  ;;  %s915_s0 = inlined_call_operand.hbm [shape: f32[16,32], index: 0, kind: input, shape index: {}]   ;;  %s916_s1 = inlined_call_operand.hbm [shape: bf16[32,32], index: 1, kind: input, shape index: {}]   ;;  %s917_s2 = inlined_call_operand.vmem [shape: f32[1,32], index: 2, kind: input, shape index: {}]   ;;  %s918_s3 = inlined_call_operand.hbm [shape: bf16[32,128], index: 3, kind: input, shape index: {}]   ;;  %s919_s4 = inlined_call_operand.vmem [shape: f32[1,128], index: 4, kind: input, shape index: {}]   ;;  %s920_s5 = inlined_call_operand.hbm [shape: f32[16,128], index: 5, kind: output, shape index: {}]  }
   0x1   :  { %12 = vsyncpa [#allocation3 + $0x1], 0 }
   0x2   :  { %13 = vsyncpa [#allocation6], 0 }
   0x3   :  { %14 = vsyncpa [#allocation4], 0 }
   0x4   :  { %16 = vsyncpa [#allocation4 + $0x1], 0  ;;  %s764_s18 = smov 0   ;;  %s766_s19 = smov 0  }
   0x5   :  { %s768_s20 = smov 0   ;;  %s770_s21 = smov 0  }
   0x6 LB: > { %s174_s24 = sshll.u32 %s916_s1, 4  ;;  %s788_s25 = sadd.s32 4294967295, %s728_s21   ;;  %s728_s21 = sphi %s770_s21, %s931_s21   ;;  %s724_s20 = sphi %s768_s20, %s930_s20   ;;  %s720_s19 = sphi %s766_s19, %s929_s19   ;;  %s716_s18 = sphi %s764_s18, %s928_s18   ;;  %s175_s24 = int_to_ptr.hbm [resolvable:$true] %s174_s24 }
   0x7   : > { %p460_p0 = scmp.ge.s32.totalorder %s728_s21, 1  ;;  %p43_p1 = scmp.eq.s32.totalorder %s788_s25, 0 }
   0x8   : > { %p163_p2 = scmp.lt.s32.totalorder %s728_s21, 3  ;;  %s730_s27 = smov [#allocation5]  }
   0x9   : > { %s176_s28 = sshll.u32 %s730_s27, 4  ;;  %s191_s6 = sshll.u32 %s918_s3, 4  ;;  %s177_s28 = int_to_ptr.vmem [resolvable:$true] %s176_s28  ;;  %s192_s6 = int_to_ptr.hbm [resolvable:$true] %s191_s6 }
   0xa   : > { %p793_p3 = pnand %p460_p0, %p163_p2  ;;  %s731_s7 = smov [#allocation7]  }
   0xb   : > { %s193_s8 = sshll.u32 %s731_s7, 4  ;;  %s732_s9 = smov 64   ;;  %s194_s8 = int_to_ptr.vmem [resolvable:$true] %s193_s8 }
   0xc   : > { %p509_p4 = pneg %p793_p3  ;;  %s733_s10 = smov 4  }
   0xd   : > { %s459_s11 = sadd.s32 4294967294, %s728_s21   ;;  %s807_s12 = sadd.s32 1, %s728_s21  }
   0xe   : > { %p510_p6 = pnand %p509_p4, %p43_p1  ;;  %s26_s13 = ssub.s32 %s728_s21, %s807_s12 }
   0xf   : > { %s29_s14 = sadd.s32 1, %s724_s20  ;;  %p27_p7 = scmp.eq.s32.totalorder %s26_s13, 0 }
  0x10   : > { %512 = dma.hbm_to_vmem [thread:$0]  (!%p510_p6), %s175_s24, 256, %s177_s28, [#allocation6], %s732_s9, %s732_s9, %s733_s10  }
  0x11   : > { %515 = dma.hbm_to_vmem [thread:$0]  (!%p510_p6), %s192_s6, 256, %s194_s8, [#allocation6], %s732_s9, %s732_s9, %s733_s10  }
  0x12   : > { %p36_p8 = scmp.ne.s32.totalorder %s724_s20, %s720_s19  ;;  %p37_p9 = scmp.eq.s32.totalorder %s728_s21, 0 }
  0x13   : > { %p42_p10 = scmp.ne.s32.totalorder %s720_s19, %s716_s18  ;;  %p150_p13 = scmp.eq.s32.totalorder %s788_s25, 1 }
  0x14   : > { %s818_s15 = scalar_select %p27_p7, %s724_s20, %s29_s14  }
  0x15   : > { %p820_p11 = por %p37_p9, %p36_p8  ;;  %p826_p12 = por %p43_p1, %p42_p10 }
  0x16   : > { %p156_p0 = scmp.eq.s32.totalorder %s459_s11, 1  ;;  %p526_p2 = scmp.lt.s32.totalorder %s728_s21, 2 }
  0x17   : > { %s210_s22 = sand.u32 1, %s724_s20   ;;  %p833_p4 = por %p150_p13, %p36_p8 }
  0x18   : > { %p837_p6 = por %p156_p0, %p42_p10  ;;  %s464_s27 = sshll.u32 %s210_s22, 3 }
  0x19   : > { %s465_s28 = sshll.u32 %s728_s21, 3  ;;  %s214_s7 = scalar_lea.vmem [#allocation2], %s464_s27 }
  0x1a   : > { %s218_s6 = scalar_lea.hbm %s915_s0, %s465_s28  ;;  %s222_s8 = sshll.u32 %s214_s7, 4  ;;  %s223_s8 = int_to_ptr.vmem [resolvable:$true] %s222_s8 }
  0x1b   : > { %s220_s9 = sshll.u32 %s218_s6, 4  ;;  %p847_p7 = pnand %p526_p2, %p820_p11  ;;  %s221_s9 = int_to_ptr.hbm [resolvable:$true] %s220_s9 }
  0x1c   : > { %s211_s11 = scalar_lea.sflag [#allocation3], %s210_s22  ;;  %s628_s13 = sshra.s32 %s221_s9, 4  ;;  %s629_s13 = int_to_ptr.hbm [resolvable:$true] %s628_s13 }
  0x1d   : > { %s630_s14 = scalar_lea.hbm %s629_s13, 8  ;;  %p632_p9 = pneg %p847_p7 }
  0x1e   : > { %p631_p8 = scmp.ne.s32.totalorder %s629_s13, %s630_s14  ;;  %s635_s29 = scalar_lea.hbm %s915_s0, 16 }
  0x1f   : > { %p636_p11 = scmp.lt.s32.totalorder %s629_s13, %s915_s0  ;;  %p637_p0 = scmp.lt.s32.totalorder %s635_s29, %s630_s14 }
  0x20   : > { %p633_p10 = pnand %p632_p9, %p631_p8 }
  0x21   : > { %p638_p2 = por %p637_p0, %p636_p11 }
  0x22   : > { %p634_p13 = pneg %p633_p10 }
  0x24   : > { %p639_p5 = pnand %p638_p2, %p634_p13 }
  0x26   : > { %642 = shalt.err (!%p639_p5)
}
  0x27   : > { %519 = dma.hbm_to_vmem [thread:$0]  (!%p847_p7), %s221_s9, 128, %s223_s8, %s211_s11  }
  0x28   : > { %231 = sbr.rel (%p793_p3) target bundleno = 322 (0x142), region = 40  ;;  %s864_s22 = sand.u32 (!%p793_p3), 1, %s720_s19  }
  0x29   : > { %s467_s6 = sshll.u32 (!%p793_p3), %s864_s22, 3  ;;  %s234_s7 = scalar_lea.sflag (!%p793_p3), [#allocation3], %s864_s22 }
  0x2a   : > { %s237_s27 = scalar_lea.vmem (!%p793_p3), [#allocation2], %s467_s6 }
  0x2d   : > { %703 = dma.done.wait (%p826_p12), %s234_s7, 128  }
  0x2e   : > { %705 = vsyncadd (%p826_p12), %s234_s7, 4294967168 }
  0x2f   : > { %707 = dma.done.wait (%p43_p1), [#allocation6], 512  }
  0x30   : > { %709 = vsyncadd (%p43_p1), [#allocation6], 4294966784  ;;  %v494_v0 = vld [vmem:[#allocation5 + $0x8] sm:$0xff]  ;;  %v493_v1 = vld [vmem:[#allocation5] sm:$0xff]  ;;  %vm298_vm0 = vcmask 261120   ;;  %s490_s8 = sshll.u32 %s788_s25, 3 }
  0x31   : > { %308 = vmatpush.bf16.msra.mxu0 %v494_v0  ;;  %v276_v2 = vld [vmem:[%s237_s27] sm:$0xff]  ;;  %s365_s11 = scalar_lea.hbm %s920_s5, %s490_s8  ;;  %s274_s28 = scalar_lea.vmem [#allocation8], %s467_s6 }
  0x32   : > { %v277_v3 = vpack.c.bf16 %v276_v2, %v276_v2  ;;  %v496_v4 = vld [vmem:[#allocation7 + $0x8] sm:$0xff]  ;;  %v495_v5 = vld [vmem:[#allocation7] sm:$0xff]  ;;  %s367_s29 = sshll.u32 %s274_s28, 4  ;;  %s369_s30 = sshll.u32 %s365_s11, 4  ;;  %s368_s29 = int_to_ptr.vmem [resolvable:$true] %s367_s29  ;;  %s370_s30 = int_to_ptr.hbm [resolvable:$true] %s369_s30 }
  0x33   : > { %346 = vmatpush.bf16.msra.mxu1 %v496_v4  ;;  %v566_v6 = vld [vmem:[%s917_s2] ss:$0 sm:$0xff]  ;;  %s355_s16 = scalar_lea.sflag [#allocation4], %s864_s22  ;;  %s672_s7 = sshra.s32 %s370_s30, 4  ;;  %s673_s7 = int_to_ptr.hbm [resolvable:$true] %s672_s7 }
  0x34   : > { %v567_v12 = vld [vmem:[%s919_s4] ss:$0 sm:$0xff]  ;;  %s674_s25 = scalar_lea.hbm %s673_s7, 8  ;;  %s678_s17 = scalar_lea.hbm %s920_s5, 16 }
  0x35   : > { %309 = vmatpush.bf16.msra.mxu0 %v493_v1  ;;  %p675_p1 = scmp.ne.s32.totalorder %s673_s7, %s674_s25  ;;  %p679_p12 = scmp.lt.s32.totalorder %s673_s7, %s920_s5 }
  0x36   : > { %p680_p7 = scmp.lt.s32.totalorder %s678_s17, %s674_s25 }
  0x37   : > { %347 = vmatpush.bf16.msra.mxu1 %v495_v5  ;;  %p676_p3 = pnand %p675_p1, %p833_p4 }
  0x38   : > { %479 = vmatmul.msk.bf16.vlgmr.msra.gmra.mxu0 %vm298_vm0, %v277_v3  ;;  %p681_p8 = por %p680_p7, %p679_p12 }
  0x39   : > { %p677_p5 = pneg %p676_p3 }
  0x3b   : > { %p682_p9 = pnand %p681_p8, %p677_p5 }
  0xb5   : > { %v311_v7 = vpop.f32.mrf.mxu0 }
  0xb6   : > { %v312_v8 = vadd.f32 %v566_v6, %v311_v7 }
  0xb8   : > { %v315_v9 = vmax.f32 %v312_v8, 0.0 }
  0xba   : > { %v316_v10 = vpack.c.bf16 %v315_v9, %v315_v9 }
  0xbc   : > { %488 = vmatmul.msk.bf16.vlgmr.msra.gmra.mxu1 %vm298_vm0, %v316_v10 }
  0xbd   : > { %v313_v11 = vpop.f32.mrf.mxu0 }
 0x139   : > { %v349_v13 = vpop.f32.mrf.mxu1 }
 0x13a   : > { %v350_v14 = vadd.f32 %v567_v12, %v349_v13 }
 0x13c   : > { %353 = vst [vmem:[%s274_s28] sm:$0xff] %v350_v14 }
 0x13d   : > { %685 = shalt.err (!%p682_p9)
}
 0x13e   : > { %507 = dma.vmem_to_hbm [thread:$0]  (%p833_p4), %s368_s29, 128, %s370_s30, %s355_s16  }
 0x141   : > { %v351_v15 = vpop.f32.mrf.mxu1 }
 0x142 PF: > { %s381_s22 = sand.u32 1, %s716_s18   ;;  %p927_p10 = scmp.ge.s32.totalorder %s728_s21, 2 }
 0x143   : > { %s382_s9 = scalar_lea.sflag [#allocation4], %s381_s22 }
 0x144   : > { %p521_p13 = pnand %p927_p10, %p837_p6 }
 0x146   : > { %p522_p11 = pneg %p521_p13 }
 0x148   : > { %711 = dma.done.wait (%p522_p11), %s382_s9, 128  }
 0x149   : > { %713 = vsyncadd (%p522_p11), %s382_s9, 4294967168  ;;  %p19_p0 = scmp.ge.s32.totalorder %s807_s12, 4   ;;  %s928_s18 = smov %s720_s19 }
 0x14a   : > { %s929_s19 = smov %s724_s20  ;;  %s930_s20 = smov %s818_s15 }
 0x14b   : > { %s931_s21 = smov %s807_s12  ;;  %21 = sbr.rel (!%p19_p0) target bundleno = 6 (0x6), region = 93 }
 0x150   :  { %388 = vsyncpa [#allocation3], 1 }
 0x151   :  { %390 = vsyncpa [#allocation3 + $0x1], 1 }
 0x152   :  { %391 = vsyncpa [#allocation6], 1 }
 0x153   :  { %392 = vsyncpa [#allocation4], 1 }
 0x154   :  { %394 = vsyncpa [#allocation4 + $0x1], 1 }

// kernel: tpu_custom_call.1
= control target key start
LH: loop header
LB: loop body
LE: loop exit
PB: predicated region body
PF: predicated region fallthrough
CT: control target
= control target key end

     0   :  { %10 = vsyncpa [#allocation3], 0  ;;  %s915_s0 = inlined_call_operand.hbm [shape: f32[16,32], index: 0, kind: input, shape index: {}]   ;;  %s916_s1 = inlined_call_operand.hbm [shape: bf16[32,32], index: 1, kind: input, shape index: {}]   ;;  %s917_s2 = inlined_call_operand.vmem [shape: f32[1,32], index: 2, kind: input, shape index: {}]   ;;  %s918_s3 = inlined_call_operand.hbm [shape: bf16[32,128], index: 3, kind: input, shape index: {}]   ;;  %s919_s4 = inlined_call_operand.vmem [shape: f32[1,128], index: 4, kind: input, shape index: {}]   ;;  %s920_s5 = inlined_call_operand.hbm [shape: f32[16,128], index: 5, kind: output, shape index: {}]  }
   0x1   :  { %12 = vsyncpa [#allocation3 + $0x1], 0 }
   0x2   :  { %13 = vsyncpa [#allocation6], 0 }
   0x3   :  { %14 = vsyncpa [#allocation4], 0 }
   0x4   :  { %16 = vsyncpa [#allocation4 + $0x1], 0  ;;  %s764_s18 = smov 0   ;;  %s766_s19 = smov 0  }
   0x5   :  { %s768_s20 = smov 0   ;;  %s770_s21 = smov 0  }
   0x6 LB: > { %s174_s24 = sshll.u32 %s916_s1, 4  ;;  %s788_s25 = sadd.s32 4294967295, %s728_s21   ;;  %s728_s21 = sphi %s770_s21, %s931_s21   ;;  %s724_s20 = sphi %s768_s20, %s930_s20   ;;  %s720_s19 = sphi %s766_s19, %s929_s19   ;;  %s716_s18 = sphi %s764_s18, %s928_s18   ;;  %s175_s24 = int_to_ptr.hbm [resolvable:$true] %s174_s24 }
   0x7   : > { %p460_p0 = scmp.ge.s32.totalorder %s728_s21, 1  ;;  %p43_p1 = scmp.eq.s32.totalorder %s788_s25, 0 }
   0x8   : > { %p163_p2 = scmp.lt.s32.totalorder %s728_s21, 3  ;;  %s730_s27 = smov [#allocation5]  }
   0x9   : > { %s176_s28 = sshll.u32 %s730_s27, 4  ;;  %s191_s6 = sshll.u32 %s918_s3, 4  ;;  %s177_s28 = int_to_ptr.vmem [resolvable:$true] %s176_s28  ;;  %s192_s6 = int_to_ptr.hbm [resolvable:$true] %s191_s6 }
   0xa   : > { %p793_p3 = pnand %p460_p0, %p163_p2  ;;  %s731_s7 = smov [#allocation7]  }
   0xb   : > { %s193_s8 = sshll.u32 %s731_s7, 4  ;;  %s732_s9 = smov 64   ;;  %s194_s8 = int_to_ptr.vmem [resolvable:$true] %s193_s8 }
   0xc   : > { %p509_p4 = pneg %p793_p3  ;;  %s733_s10 = smov 4  }
   0xd   : > { %s459_s11 = sadd.s32 4294967294, %s728_s21   ;;  %s807_s12 = sadd.s32 1, %s728_s21  }
   0xe   : > { %p510_p6 = pnand %p509_p4, %p43_p1  ;;  %s26_s13 = ssub.s32 %s728_s21, %s807_s12 }
   0xf   : > { %s29_s14 = sadd.s32 1, %s724_s20  ;;  %p27_p7 = scmp.eq.s32.totalorder %s26_s13, 0 }
  0x10   : > { %512 = dma.hbm_to_vmem [thread:$0]  (!%p510_p6), %s175_s24, 256, %s177_s28, [#allocation6], %s732_s9, %s732_s9, %s733_s10  }
  0x11   : > { %515 = dma.hbm_to_vmem [thread:$0]  (!%p510_p6), %s192_s6, 256, %s194_s8, [#allocation6], %s732_s9, %s732_s9, %s733_s10  }
  0x12   : > { %p36_p8 = scmp.ne.s32.totalorder %s724_s20, %s720_s19  ;;  %p37_p9 = scmp.eq.s32.totalorder %s728_s21, 0 }
  0x13   : > { %p42_p10 = scmp.ne.s32.totalorder %s720_s19, %s716_s18  ;;  %p150_p13 = scmp.eq.s32.totalorder %s788_s25, 1 }
  0x14   : > { %s818_s15 = scalar_select %p27_p7, %s724_s20, %s29_s14  }
  0x15   : > { %p820_p11 = por %p37_p9, %p36_p8  ;;  %p826_p12 = por %p43_p1, %p42_p10 }
  0x16   : > { %p156_p0 = scmp.eq.s32.totalorder %s459_s11, 1  ;;  %p526_p2 = scmp.lt.s32.totalorder %s728_s21, 2 }
  0x17   : > { %s210_s22 = sand.u32 1, %s724_s20   ;;  %p833_p4 = por %p150_p13, %p36_p8 }
  0x18   : > { %p837_p6 = por %p156_p0, %p42_p10  ;;  %s464_s27 = sshll.u32 %s210_s22, 3 }
  0x19   : > { %s465_s28 = sshll.u32 %s728_s21, 3  ;;  %s214_s7 = scalar_lea.vmem [#allocation2], %s464_s27 }
  0x1a   : > { %s218_s6 = scalar_lea.hbm %s915_s0, %s465_s28  ;;  %s222_s8 = sshll.u32 %s214_s7, 4  ;;  %s223_s8 = int_to_ptr.vmem [resolvable:$true] %s222_s8 }
  0x1b   : > { %s220_s9 = sshll.u32 %s218_s6, 4  ;;  %p847_p7 = pnand %p526_p2, %p820_p11  ;;  %s221_s9 = int_to_ptr.hbm [resolvable:$true] %s220_s9 }
  0x1c   : > { %s211_s11 = scalar_lea.sflag [#allocation3], %s210_s22  ;;  %s628_s13 = sshra.s32 %s221_s9, 4  ;;  %s629_s13 = int_to_ptr.hbm [resolvable:$true] %s628_s13 }
  0x1d   : > { %s630_s14 = scalar_lea.hbm %s629_s13, 8  ;;  %p632_p9 = pneg %p847_p7 }
  0x1e   : > { %p631_p8 = scmp.ne.s32.totalorder %s629_s13, %s630_s14  ;;  %s635_s29 = scalar_lea.hbm %s915_s0, 16 }
  0x1f   : > { %p636_p11 = scmp.lt.s32.totalorder %s629_s13, %s915_s0  ;;  %p637_p0 = scmp.lt.s32.totalorder %s635_s29, %s630_s14 }
  0x20   : > { %p633_p10 = pnand %p632_p9, %p631_p8 }
  0x21   : > { %p638_p2 = por %p637_p0, %p636_p11 }
  0x22   : > { %p634_p13 = pneg %p633_p10 }
  0x24   : > { %p639_p5 = pnand %p638_p2, %p634_p13 }
  0x26   : > { %642 = shalt.err (!%p639_p5)
}
  0x27   : > { %519 = dma.hbm_to_vmem [thread:$0]  (!%p847_p7), %s221_s9, 128, %s223_s8, %s211_s11  }
  0x28   : > { %231 = sbr.rel (%p793_p3) target bundleno = 322 (0x142), region = 40  ;;  %s864_s22 = sand.u32 (!%p793_p3), 1, %s720_s19  }
  0x29   : > { %s467_s6 = sshll.u32 (!%p793_p3), %s864_s22, 3  ;;  %s234_s7 = scalar_lea.sflag (!%p793_p3), [#allocation3], %s864_s22 }
  0x2a   : > { %s237_s27 = scalar_lea.vmem (!%p793_p3), [#allocation2], %s467_s6 }
  0x2d   : > { %703 = dma.done.wait (%p826_p12), %s234_s7, 128  }
  0x2e   : > { %705 = vsyncadd (%p826_p12), %s234_s7, 4294967168 }
  0x2f   : > { %707 = dma.done.wait (%p43_p1), [#allocation6], 512  }
  0x30   : > { %709 = vsyncadd (%p43_p1), [#allocation6], 4294966784  ;;  %v494_v0 = vld [vmem:[#allocation5 + $0x8] sm:$0xff]  ;;  %v493_v1 = vld [vmem:[#allocation5] sm:$0xff]  ;;  %vm298_vm0 = vcmask 261120   ;;  %s490_s8 = sshll.u32 %s788_s25, 3 }
  0x31   : > { %308 = vmatpush.bf16.msra.mxu0 %v494_v0  ;;  %v276_v2 = vld [vmem:[%s237_s27] sm:$0xff]  ;;  %s365_s11 = scalar_lea.hbm %s920_s5, %s490_s8  ;;  %s274_s28 = scalar_lea.vmem [#allocation8], %s467_s6 }
  0x32   : > { %v277_v3 = vpack.c.bf16 %v276_v2, %v276_v2  ;;  %v496_v4 = vld [vmem:[#allocation7 + $0x8] sm:$0xff]  ;;  %v495_v5 = vld [vmem:[#allocation7] sm:$0xff]  ;;  %s367_s29 = sshll.u32 %s274_s28, 4  ;;  %s369_s30 = sshll.u32 %s365_s11, 4  ;;  %s368_s29 = int_to_ptr.vmem [resolvable:$true] %s367_s29  ;;  %s370_s30 = int_to_ptr.hbm [resolvable:$true] %s369_s30 }
  0x33   : > { %346 = vmatpush.bf16.msra.mxu1 %v496_v4  ;;  %v566_v6 = vld [vmem:[%s917_s2] ss:$0 sm:$0xff]  ;;  %s355_s16 = scalar_lea.sflag [#allocation4], %s864_s22  ;;  %s672_s7 = sshra.s32 %s370_s30, 4  ;;  %s673_s7 = int_to_ptr.hbm [resolvable:$true] %s672_s7 }
  0x34   : > { %v567_v12 = vld [vmem:[%s919_s4] ss:$0 sm:$0xff]  ;;  %s674_s25 = scalar_lea.hbm %s673_s7, 8  ;;  %s678_s17 = scalar_lea.hbm %s920_s5, 16 }
  0x35   : > { %309 = vmatpush.bf16.msra.mxu0 %v493_v1  ;;  %p675_p1 = scmp.ne.s32.totalorder %s673_s7, %s674_s25  ;;  %p679_p12 = scmp.lt.s32.totalorder %s673_s7, %s920_s5 }
  0x36   : > { %p680_p7 = scmp.lt.s32.totalorder %s678_s17, %s674_s25 }
  0x37   : > { %347 = vmatpush.bf16.msra.mxu1 %v495_v5  ;;  %p676_p3 = pnand %p675_p1, %p833_p4 }
  0x38   : > { %479 = vmatmul.msk.bf16.vlgmr.msra.gmra.mxu0 %vm298_vm0, %v277_v3  ;;  %p681_p8 = por %p680_p7, %p679_p12 }
  0x39   : > { %p677_p5 = pneg %p676_p3 }
  0x3b   : > { %p682_p9 = pnand %p681_p8, %p677_p5 }
  0xb5   : > { %v311_v7 = vpop.f32.mrf.mxu0 }
  0xb6   : > { %v312_v8 = vadd.f32 %v566_v6, %v311_v7 }
  0xb8   : > { %v315_v9 = vmax.f32 %v312_v8, 0.0 }
  0xba   : > { %v316_v10 = vpack.c.bf16 %v315_v9, %v315_v9 }
  0xbc   : > { %488 = vmatmul.msk.bf16.vlgmr.msra.gmra.mxu1 %vm298_vm0, %v316_v10 }
  0xbd   : > { %v313_v11 = vpop.f32.mrf.mxu0 }
 0x139   : > { %v349_v13 = vpop.f32.mrf.mxu1 }
 0x13a   : > { %v350_v14 = vadd.f32 %v567_v12, %v349_v13 }
 0x13c   : > { %353 = vst [vmem:[%s274_s28] sm:$0xff] %v350_v14 }
 0x13d   : > { %685 = shalt.err (!%p682_p9)
}
 0x13e   : > { %507 = dma.vmem_to_hbm [thread:$0]  (%p833_p4), %s368_s29, 128, %s370_s30, %s355_s16  }
 0x141   : > { %v351_v15 = vpop.f32.mrf.mxu1 }
 0x142 PF: > { %s381_s22 = sand.u32 1, %s716_s18   ;;  %p927_p10 = scmp.ge.s32.totalorder %s728_s21, 2 }
 0x143   : > { %s382_s9 = scalar_lea.sflag [#allocation4], %s381_s22 }
 0x144   : > { %p521_p13 = pnand %p927_p10, %p837_p6 }
 0x146   : > { %p522_p11 = pneg %p521_p13 }
 0x148   : > { %711 = dma.done.wait (%p522_p11), %s382_s9, 128  }
 0x149   : > { %713 = vsyncadd (%p522_p11), %s382_s9, 4294967168  ;;  %p19_p0 = scmp.ge.s32.totalorder %s807_s12, 4   ;;  %s928_s18 = smov %s720_s19 }
 0x14a   : > { %s929_s19 = smov %s724_s20  ;;  %s930_s20 = smov %s818_s15 }
 0x14b   : > { %s931_s21 = smov %s807_s12  ;;  %21 = sbr.rel (!%p19_p0) target bundleno = 6 (0x6), region = 93 }
 0x150   :  { %388 = vsyncpa [#allocation3], 1 }
 0x151   :  { %390 = vsyncpa [#allocation3 + $0x1], 1 }
 0x152   :  { %391 = vsyncpa [#allocation6], 1 }
 0x153   :  { %392 = vsyncpa [#allocation4], 1 }
 0x154   :  { %394 = vsyncpa [#allocation4 + $0x1], 1 }

</bundles_post_ra>
